<compile_context>
chip_gen: v5e
topology: v5e:2x2
jax: 0.10.0
libtpu: 0.0.40
codegen_flags: <defaults>
</compile_context>

<pallas_src>
import jax
import jax.numpy as jnp
from jax.experimental import pallas as pl
from jax.experimental.pallas import tpu as pltpu


def identity_kernel(x_ref, o_ref):
    # Straight tile copy: one DMA'd VMEM block in, same block out.
    o_ref[...] = x_ref[...]


def _pick_block(dim, pack, target):
    """Largest tile <= target that is a multiple of `pack` and divides `dim`.

    Falls back to the full extent when the dim is small or not aligned to the
    (8, 128) packing, which is always a legal block shape.
    """
    if dim <= target or dim % pack != 0:
        return dim
    t = target - (target % pack)
    while dim % t != 0:
        t -= pack
    return t


def identity_pallas(x):
    """Identity forward: returns an array equal to `x` (any shape/dtype)."""
    orig_shape = x.shape

    # Present the data as a 2-D slab (rows, lanes): last dim -> 128-lane axis.
    if x.ndim == 0:
        x2d = x.reshape(1, 1)
    elif x.ndim == 1:
        x2d = x.reshape(1, -1)
    else:
        x2d = x.reshape(-1, x.shape[-1])
    M, N = x2d.shape

    # Big tiles for the mem-bound copy (512x1024 f32 ~ 2 MiB/block, well under
    # the v7x 64 MiB VMEM budget even with double-buffered in+out), full-extent
    # fallback for small / unaligned dims.
    bm = _pick_block(M, 8, 512)
    bn = _pick_block(N, 128, 1024)
    grid = (M // bm, N // bn)

    itemsize = jnp.dtype(x.dtype).itemsize

    out = pl.pallas_call(
        identity_kernel,
        out_shape=jax.ShapeDtypeStruct((M, N), x.dtype),
        grid_spec=pltpu.PrefetchScalarGridSpec(
            num_scalar_prefetch=0,
            grid=grid,
            in_specs=[pl.BlockSpec((bm, bn), lambda i, j: (i, j))],
            out_specs=pl.BlockSpec((bm, bn), lambda i, j: (i, j)),
        ),
        compiler_params=pltpu.CompilerParams(
            dimension_semantics=("parallel", "parallel")),
        cost_estimate=pl.CostEstimate(
            flops=0,
            transcendentals=0,
            bytes_accessed=2 * x.size * itemsize),
    )(x2d)
    return out.reshape(orig_shape)


if __name__ == "__main__":
    key = jax.random.PRNGKey(0)

    # Small deterministic example input consistent with the module.
    x = jax.random.normal(key, (2, 4, 16, 16), jnp.float32)

    y = identity_pallas(x)
    y = jax.block_until_ready(y)

    assert y.shape == x.shape
    assert y.dtype == x.dtype
    assert jnp.array_equal(y, x)

    print("KERNEL_OK")
</pallas_src>

<mosaic_0001>
module attributes {stable_mosaic.version = 11 : i64} {
  func.func @identity_kernel(%arg0: i32, %arg1: i32, %arg2: memref<128x16xf32, #tpu.memory_space<vmem>>, %arg3: memref<128x16xf32, #tpu.memory_space<vmem>>) attributes {dimension_semantics = [#tpu.dimension_semantics<parallel>, #tpu.dimension_semantics<parallel>], iteration_bounds = array<i64: 1, 1>, scalar_prefetch = 0 : i64, scratch_operands = 0 : i64, tpu.core_type = #tpu.core_type<tc>, window_params = [{transform_indices = @transform_0, window_bounds = array<i64: 128, 16>}, {transform_indices = @transform_1, window_bounds = array<i64: 128, 16>}]} {
    %c0 = arith.constant 0 : index
    %c0_0 = arith.constant 0 : index
    %0 = vector.load %arg2[%c0, %c0_0] : memref<128x16xf32, #tpu.memory_space<vmem>>, vector<128x16xf32>
    %c0_1 = arith.constant 0 : index
    %c0_2 = arith.constant 0 : index
    %1 = vector.load %arg3[%c0_1, %c0_2] : memref<128x16xf32, #tpu.memory_space<vmem>>, vector<128x16xf32>
    tpu.vector_store %arg3[%c0_1, %c0_2], %0 {strides = array<i32>} : memref<128x16xf32, #tpu.memory_space<vmem>>, vector<128x16xf32>,
    return
  }
  func.func @transform_0(%arg0: i32, %arg1: i32) -> (i32, i32) {
    %c0_i32 = arith.constant 0 : i32
    return %arg0, %arg1 : i32, i32
  }
  func.func @transform_1(%arg0: i32, %arg1: i32) -> (i32, i32) {
    %c0_i32 = arith.constant 0 : i32
    return %arg0, %arg1 : i32, i32
  }
}

</mosaic_0001>

<bundles_post_ra>
// kernel: tpu_custom_call.1
= control target key start
LH: loop header
LB: loop body
LE: loop exit
PB: predicated region body
PF: predicated region fallthrough
CT: control target
= control target key end

     0   :  { %vm24_vm0 = vcmask 130048   ;;  %s167_s0 = inlined_call_operand.vmem [shape: f32[128,16], index: 0, kind: input, shape index: {}]   ;;  %s168_s1 = inlined_call_operand.vmem [shape: f32[128,16], index: 1, kind: output, shape index: {}]  }
   0x1   :  { %v8_v0 = vld [vmem:[%s167_s0] sm:$0xff]  ;;  %v9_v1 = vld [vmem:[%s167_s0 + $0x8] sm:$0xff]  ;;  %v10_v2 = vld [vmem:[%s167_s0 + $0x10] sm:$0xff] }
   0x2   :  { %25 = vst.msk [vmem:[%s168_s1] sm:$0xff] %vm24_vm0, %v8_v0  ;;  %v11_v3 = vld [vmem:[%s167_s0 + $0x18] sm:$0xff]  ;;  %v12_v4 = vld [vmem:[%s167_s0 + $0x20] sm:$0xff]  ;;  %v13_v5 = vld [vmem:[%s167_s0 + $0x28] sm:$0xff] }
   0x3   :  { %26 = vst.msk [vmem:[%s168_s1 + $0x8] sm:$0xff] %vm24_vm0, %v9_v1  ;;  %v14_v6 = vld [vmem:[%s167_s0 + $0x30] sm:$0xff]  ;;  %v15_v7 = vld [vmem:[%s167_s0 + $0x38] sm:$0xff]  ;;  %v16_v8 = vld [vmem:[%s167_s0 + $0x40] sm:$0xff] }
   0x4   :  { %27 = vst.msk [vmem:[%s168_s1 + $0x10] sm:$0xff] %vm24_vm0, %v10_v2  ;;  %v17_v9 = vld [vmem:[%s167_s0 + $0x48] sm:$0xff]  ;;  %v18_v10 = vld [vmem:[%s167_s0 + $0x50] sm:$0xff]  ;;  %v19_v11 = vld [vmem:[%s167_s0 + $0x58] sm:$0xff] }
   0x5   :  { %28 = vst.msk [vmem:[%s168_s1 + $0x18] sm:$0xff] %vm24_vm0, %v11_v3  ;;  %v20_v12 = vld [vmem:[%s167_s0 + $0x60] sm:$0xff]  ;;  %v21_v13 = vld [vmem:[%s167_s0 + $0x68] sm:$0xff]  ;;  %v22_v14 = vld [vmem:[%s167_s0 + $0x70] sm:$0xff] }
   0x6   :  { %29 = vst.msk [vmem:[%s168_s1 + $0x20] sm:$0xff] %vm24_vm0, %v12_v4  ;;  %v23_v15 = vld [vmem:[%s167_s0 + $0x78] sm:$0xff] }
   0x7   :  { %30 = vst.msk [vmem:[%s168_s1 + $0x28] sm:$0xff] %vm24_vm0, %v13_v5 }
   0x8   :  { %31 = vst.msk [vmem:[%s168_s1 + $0x30] sm:$0xff] %vm24_vm0, %v14_v6 }
   0x9   :  { %32 = vst.msk [vmem:[%s168_s1 + $0x38] sm:$0xff] %vm24_vm0, %v15_v7 }
   0xa   :  { %33 = vst.msk [vmem:[%s168_s1 + $0x40] sm:$0xff] %vm24_vm0, %v16_v8 }
   0xb   :  { %34 = vst.msk [vmem:[%s168_s1 + $0x48] sm:$0xff] %vm24_vm0, %v17_v9 }
   0xc   :  { %35 = vst.msk [vmem:[%s168_s1 + $0x50] sm:$0xff] %vm24_vm0, %v18_v10 }
   0xd   :  { %36 = vst.msk [vmem:[%s168_s1 + $0x58] sm:$0xff] %vm24_vm0, %v19_v11 }
   0xe   :  { %37 = vst.msk [vmem:[%s168_s1 + $0x60] sm:$0xff] %vm24_vm0, %v20_v12 }
   0xf   :  { %38 = vst.msk [vmem:[%s168_s1 + $0x68] sm:$0xff] %vm24_vm0, %v21_v13 }
  0x10   :  { %39 = vst.msk [vmem:[%s168_s1 + $0x70] sm:$0xff] %vm24_vm0, %v22_v14 }
  0x11   :  { %40 = vst.msk [vmem:[%s168_s1 + $0x78] sm:$0xff] %vm24_vm0, %v23_v15 }

</bundles_post_ra>
